<compile_context>
chip_gen: v6e
topology: v6e:2x2x1
jax: 0.10.0
libtpu: 0.0.40
codegen_flags: <defaults>
</compile_context>

<pallas_src>
import jax
import jax.numpy as jnp
from jax.experimental import pallas as pl
from jax.experimental.pallas import tpu as pltpu


def _round_up(n, m):
    return ((n + m - 1) // m) * m


# Double-buffered x-stream budget (2 tiles). 8 MiB/tile already sits well past
# the measured ~85% HBM-roofline knee on v5e/v6e/v7x while leaving VMEM slack
# everywhere (v7x has only 64 MiB physical).
_STREAM_BUDGET_BYTES = 16 * 1024 * 1024
_VMEM_LIMIT_BYTES = 32 * 1024 * 1024


def _choose_tile_cols(batch, n_features, itemsize=4):
    """Batch-tile width (lane axis of the streamed (F, TB) tile)."""
    f_pad = _round_up(max(n_features, 1), 8)          # sublane padding of the tile
    per_col_bytes = itemsize * f_pad
    budget_cols = _STREAM_BUDGET_BYTES // (2 * per_col_bytes)   # 2 = double buffer
    budget_cols = max(128, (budget_cols // 128) * 128)           # lane aligned
    if batch <= budget_cols:
        # One tile covers the whole batch; a full-extent block dim is always legal.
        return batch
    # Multiple of 128; the last block may be partial and Pallas masks it.
    return budget_cols
    # TODO(synk): for very large F, also tile the feature axis and accumulate.


def _logreg_kernel(xt_ref, w_ref, b_ref, o_ref):
    # xt_ref: (F, TB) VMEM streamed batch tile (batch on the lane axis)
    # w_ref:  (8, F)  VMEM resident, 8 identical replicated weight rows
    # b_ref:  (1, 1)  SMEM scalar bias
    # o_ref:  (1, TB) VMEM lane-dense output row
    logits8 = jnp.dot(w_ref[...], xt_ref[...],
                      preferred_element_type=jnp.float32)   # (8, TB), rows identical
    row = logits8[0:1, :] + b_ref[0, 0]                      # (1, TB) + scalar bias
    o_ref[...] = jax.nn.sigmoid(row).astype(o_ref.dtype)


def logistic_regression(x, w, b, *, tile_cols=None):
    """x: (B, F), w: (F, 1) or (F,), b: (1,) / (1,1) / scalar -> (B, 1) probabilities."""
    B, F = x.shape
    w = jnp.asarray(w).reshape(F, 1)
    b = jnp.asarray(b, jnp.float32).reshape(1, 1)     # nn.Linear bias is (1,)

    # Features-major stream: lane-dense tiles even when F << 128.
    # TODO(synk): callers holding feature-major activations should pass them
    # directly to skip this one-off relayout.
    xt = x.T                                          # (F, B)

    TB = _choose_tile_cols(B, F) if tile_cols is None else tile_cols
    G = pl.cdiv(B, TB)

    # Replicate the weight row across 8 sublanes -> MXU-friendly LHS.
    # (For very large F, a (1, F) weight would save a few MiB of resident VMEM.)
    w_rows = jnp.broadcast_to(w.reshape(1, F).astype(x.dtype), (8, F))

    out = pl.pallas_call(
        _logreg_kernel,
        out_shape=jax.ShapeDtypeStruct((1, B), jnp.float32),
        grid=(G,),
        in_specs=[
            pl.BlockSpec((F, TB), lambda i: (0, i)),             # stream batch tiles
            pl.BlockSpec((8, F), lambda i: (0, 0)),              # weight resident in VMEM
            pl.BlockSpec(memory_space=pltpu.MemorySpace.SMEM),   # bias scalar in SMEM
        ],
        out_specs=pl.BlockSpec((1, TB), lambda i: (0, i)),       # lane-dense output
        compiler_params=pltpu.CompilerParams(
            dimension_semantics=("parallel",),                   # independent tiles
            vmem_limit_bytes=_VMEM_LIMIT_BYTES),
        cost_estimate=pl.CostEstimate(
            flops=2 * B * F,
            transcendentals=B,
            bytes_accessed=4 * (B * F + 8 * F + 1 + B)),
    )(xt, w_rows, b)

    # PyTorch-shaped (B, 1) result; any masked tail was never written.
    return out[0, :].reshape(B, 1)


if __name__ == "__main__":
    key = jax.random.PRNGKey(0)
    kx, kw, kb = jax.random.split(key, 3)

    batch = 8
    n_features = 32  # n_input_features

    x = jax.random.normal(kx, (batch, n_features), dtype=jnp.float32)
    # Deterministic param init mimicking nn.Linear's uniform(-1/sqrt(F), 1/sqrt(F))
    bound = 1.0 / jnp.sqrt(jnp.float32(n_features))
    w = jax.random.uniform(kw, (n_features, 1), minval=-bound, maxval=bound,
                           dtype=jnp.float32)
    b = jax.random.uniform(kb, (1,), minval=-bound, maxval=bound,
                           dtype=jnp.float32)           # nn.Linear bias shape (1,)

    y = logistic_regression(x, w, b)
    jax.block_until_ready(y)

    y_ref = jax.nn.sigmoid(x @ w + b.reshape(1, 1))
    assert y.shape == (batch, 1)
    assert jnp.allclose(y, y_ref, atol=1e-5, rtol=1e-5)

    # Exercise the no-pad / masked-partial-last-block path: B not a multiple of TB.
    batch2 = 200
    x2 = jax.random.normal(kx, (batch2, n_features), dtype=jnp.float32)
    y2 = logistic_regression(x2, w, b, tile_cols=128)   # grid=2, last block partial
    jax.block_until_ready(y2)
    y2_ref = jax.nn.sigmoid(x2 @ w + b.reshape(1, 1))
    assert y2.shape == (batch2, 1)
    assert jnp.allclose(y2, y2_ref, atol=1e-5, rtol=1e-5)

    print("KERNEL_OK")
</pallas_src>

<mosaic_0001>
module attributes {stable_mosaic.version = 11 : i64} {
  func.func @_logreg_kernel(%arg0: i32, %arg1: memref<32x8xf32, #tpu.memory_space<vmem>>, %arg2: memref<8x32xf32, #tpu.memory_space<vmem>>, %arg3: memref<1x1xf32, #tpu.memory_space<smem>>, %arg4: memref<1x8xf32, #tpu.memory_space<vmem>>) attributes {dimension_semantics = [#tpu.dimension_semantics<parallel>], iteration_bounds = array<i64: 1>, scalar_prefetch = 0 : i64, scratch_operands = 0 : i64, tpu.core_type = #tpu.core_type<tc>, window_params = [{transform_indices = @transform_0, window_bounds = array<i64: 32, 8>}, {pipeline_mode = #tpu.pipeline_mode<synchronous>, transform_indices = @transform_1, window_bounds = array<i64: 8, 32>}, {transform_indices = @transform_2, window_bounds = array<i64: 1, 1>}, {transform_indices = @transform_3, window_bounds = array<i64: 1, 8>}]} {
    %c0 = arith.constant 0 : index
    %c0_0 = arith.constant 0 : index
    %0 = vector.load %arg2[%c0, %c0_0] : memref<8x32xf32, #tpu.memory_space<vmem>>, vector<8x32xf32>
    %c0_1 = arith.constant 0 : index
    %c0_2 = arith.constant 0 : index
    %1 = vector.load %arg1[%c0_1, %c0_2] : memref<32x8xf32, #tpu.memory_space<vmem>>, vector<32x8xf32>
    %cst = arith.constant dense<0.000000e+00> : vector<8x8xf32>
    %2 = tpu.matmul %0, %1, %cst {dimension_numbers = #tpu.dot_dimension_numbers<[1], [0], [0], [1], [0, 0, 1, 1], [], []>} : vector<8x32xf32>, vector<32x8xf32>, vector<8x8xf32> -> vector<8x8xf32>
    %3 = vector.extract_strided_slice %2 {offsets = [0, 0], sizes = [1, 8], strides = [1, 1]} : vector<8x8xf32> to vector<1x8xf32>
    %c0_3 = arith.constant 0 : index
    %c0_4 = arith.constant 0 : index
    %4 = memref.load %arg3[%c0_3, %c0_4] : memref<1x1xf32, #tpu.memory_space<smem>>
    %5 = vector.broadcast %4 : f32 to vector<1x8xf32>
    %6 = arith.addf %3, %5 : vector<1x8xf32>
    %7 = arith.negf %6 : vector<1x8xf32>
    %8 = math.exp %7 : vector<1x8xf32>
    %cst_5 = arith.constant 1.000000e+00 : f32
    %9 = vector.broadcast %cst_5 : f32 to vector<1x8xf32>
    %10 = arith.addf %9, %8 : vector<1x8xf32>
    %11 = arith.divf %9, %10 : vector<1x8xf32>
    %c0_6 = arith.constant 0 : index
    %c0_7 = arith.constant 0 : index
    %12 = vector.load %arg4[%c0_6, %c0_7] : memref<1x8xf32, #tpu.memory_space<vmem>>, vector<1x8xf32>
    tpu.vector_store %arg4[%c0_6, %c0_7], %11 {strides = array<i32>} : memref<1x8xf32, #tpu.memory_space<vmem>>, vector<1x8xf32>,
    return
  }
  func.func @transform_0(%arg0: i32) -> (i32, i32) {
    %c0_i32 = arith.constant 0 : i32
    %c0_i32_0 = arith.constant 0 : i32
    return %c0_i32, %arg0 : i32, i32
  }
  func.func @transform_1(%arg0: i32) -> (i32, i32) {
    %c0_i32 = arith.constant 0 : i32
    %c0_i32_0 = arith.constant 0 : i32
    %c0_i32_1 = arith.constant 0 : i32
    return %c0_i32, %c0_i32_0 : i32, i32
  }
  func.func @transform_2(%arg0: i32) -> (i32, i32) {
    %c0_i32 = arith.constant 0 : i32
    %c0_i32_0 = arith.constant 0 : i32
    %c0_i32_1 = arith.constant 0 : i32
    return %c0_i32, %c0_i32_0 : i32, i32
  }
  func.func @transform_3(%arg0: i32) -> (i32, i32) {
    %c0_i32 = arith.constant 0 : i32
    %c0_i32_0 = arith.constant 0 : i32
    return %c0_i32, %arg0 : i32, i32
  }
}

</mosaic_0001>

<bundles_post_ra>
// kernel: tpu_custom_call.1
= control target key start
LH: loop header
LB: loop body
LE: loop exit
PB: predicated region body
PF: predicated region fallthrough
CT: control target
= control target key end

     0   :  { %v167_v1 = vmov 0.0   ;;  %vm168_vm0 = vmmov 0   ;;  %s211_s0 = inlined_call_operand.vmem [shape: f32[32,8], index: 0, kind: input, shape index: {}]   ;;  %s212_s1 = inlined_call_operand.vmem [shape: f32[8,32], index: 1, kind: input, shape index: {}]   ;;  %s213_s2 = inlined_call_operand.<no memory space> [shape: f32[1,1], index: 2, kind: input, shape index: {}]   ;;  %s214_s3 = inlined_call_operand.hbm [shape: f32[1,8], index: 3, kind: output, shape index: {}]  }
   0x1   :  { %v20_v0 = vld [vmem:[%s211_s0 + $0x18] sm:$0xff]  ;;  %127 = vmatprep.subr.mxu0 %v167_v1  ;;  %v19_v2 = vld [vmem:[%s211_s0 + $0x10] sm:$0xff]  ;;  %135 = vmatprep.mubr.msk.f32.mxu0 %vm168_vm0, %v167_v1 }
   0x2   :  { %9 = vsyncpa [#allocation4], 0  ;;  %128 = vmatpush3.msra.mxu0 %v20_v0  ;;  %v18_v3 = vld [vmem:[%s211_s0 + $0x8] sm:$0xff]  ;;  %v17_v4 = vld [vmem:[%s211_s0] sm:$0xff]  ;;  %vm21_vm1 = vcmask 261120   ;;  %v96_v6 = vstv %s213_s2  ;;  %s169_s0 = smov [#allocation3]  }
   0x3   :  { %129 = vmatprep.subr.mxu0 %v167_v1  ;;  %v16_v5 = vld [vmem:[%s212_s1] sm:$0xff]  ;;  %s112_s24 = sshll.u32 %s169_s0, 4  ;;  %vm104_vm2 = vcmask 57344   ;;  %s113_s24 = int_to_ptr.vmem [resolvable:$true] %s112_s24 }
   0x4   :  { %130 = vmatpush3.msra.mxu0 %v19_v2  ;;  %s145_s1 = scalar_lea.vmem %s113_s24, 16  ;;  %s149_s25 = scalar_lea.vmem %s113_s24, 32 }
   0x5   :  { %131 = vmatprep.subr.mxu0 %v167_v1  ;;  %p146_p0 = scmp.ne.s32.totalorder %s113_s24, %s145_s1  ;;  %p150_p1 = scmp.lt.s32.totalorder %s113_s24, %s113_s24 }
   0x6   :  { %132 = vmatpush3.msra.mxu0 %v18_v3  ;;  %p151_p2 = scmp.lt.s32.totalorder %s149_s25, %s145_s1 }
   0x7   :  { %133 = vmatprep.subr.mxu0 %v167_v1 }
   0x8   :  { %134 = vmatpush3.msra.mxu0 %v17_v4  ;;  %p152_p3 = por %p151_p2, %p150_p1 }
   0x9   :  { %136 = vmatmul.mubr.msk.f32.vlgmr.msra.gmra.mxu0 %vm21_vm1, %v16_v5 }
   0xa   :  { %p153_p4 = pnand %p152_p3, %p146_p0 }
  0xc9   :  { %v91_v7 = vpop.f32.mrf.mxu0 }
  0xca   :  { %v97_v8 = vadd.f32 %v96_v6, %v91_v7 }
  0xcb   :  { %v137_v9 = vpop.f32.mrf.mxu0 }
  0xcc   :  { %v121_v10 = vmul.f32 -1.442695, %v97_v8 }
  0xce   :  { %141 = vpow2.f32 %v121_v10 }
  0xdb   :  { %v142_v11 = vpop.eup %141 }
  0xdc   :  { %v101_v12 = vadd.f32 1.0, %v142_v11 }
  0xde   :  { %143 = vrcp.f32 %v101_v12 }
  0xeb   :  { %v144_v13 = vpop.eup %143 }
  0xec   :  { %105 = vst.msk [vmem:[#allocation3] sm:$0x1] %vm104_vm2, %v144_v13 }
  0xed   :  { %156 = shalt.err (!%p153_p4)
}
  0xee   :  { %115 = dma.vmem_to_hbm [thread:$0]  %s113_s24, 16, %s214_s3, [#allocation4]  }
  0xef   :  { %165 = dma.done.wait [#allocation4], 16  }
  0xf0   :  { %166 = vsyncadd [#allocation4], 4294967280 }
  0xf1   :  { %119 = vsyncpa [#allocation4], 1 }

</bundles_post_ra>
